<compile_context>
chip_gen: v7x
topology: tpu7x:2x2x1
jax: 0.10.0
libtpu: 0.0.40
codegen_flags: <defaults>
</compile_context>

<pallas_src>
import functools

import jax
import jax.numpy as jnp
from jax.experimental import pallas as pl
from jax.experimental.pallas import tpu as pltpu


def _avg_pool_sum_kernel(x_ref, o_ref, *, seq_len, tile_s, k_per_chunk, ragged):
    """Accumulate f32 partial sums of (TB, TS, TH) tiles over the seq axis.

    The (TB, TH) output block is the accumulator: its block index does not
    depend on the innermost seq axis, so it stays resident in VMEM across k.
    """
    k = pl.program_id(3)

    @pl.when(k == 0)
    def _init():
        o_ref[...] = jnp.zeros_like(o_ref)

    if not ragged:
        # Pure load + accumulate inner loop: no mask work at all.
        o_ref[...] += jnp.sum(x_ref[...], axis=1, dtype=jnp.float32)
    else:
        c = pl.program_id(0)
        start = (c * k_per_chunk + k) * tile_s   # element offset along seq
        rem = seq_len - start                    # valid rows left in this tile

        @pl.when(rem >= tile_s)
        def _full():
            o_ref[...] += jnp.sum(x_ref[...], axis=1, dtype=jnp.float32)

        @pl.when(rem < tile_s)
        def _partial():
            # Only the genuinely ragged (or clamped, fully out-of-range) tile
            # pays for the iota + select.
            row = jax.lax.broadcasted_iota(jnp.int32, (1, tile_s, 1), 1)
            x = x_ref[...]
            x = jnp.where(row < rem, x, jnp.zeros((), x.dtype))
            o_ref[...] += jnp.sum(x, axis=1, dtype=jnp.float32)


def avg_pooler(hidden_states, *, per_buffer_bytes=8 * 1024 * 1024,
               vmem_limit_bytes=48 * 1024 * 1024):
    """hidden_states: (B, S, H) -> (B, H), mean over the sequence axis."""
    B, S, H = hidden_states.shape
    dtype = hidden_states.dtype
    itemsize = jnp.dtype(dtype).itemsize
    # dtype-native sublane packing for the seq (second-to-last) block dim.
    sub = {4: 8, 2: 16, 1: 32}.get(itemsize, 8)

    # --- batch tile: full batch if small (full-extent block is always legal),
    # otherwise 8 rows; a ragged last batch block is handled by Pallas
    # boundary masking (dropped writes), never a (1, H) block.
    tb = B if B <= 8 else 8

    # --- hidden tile: full H unless even the minimal seq tile would blow the
    # per-buffer budget (only for enormous H); then tile H in 128-lane chunks.
    if H <= 128 or tb * sub * H * itemsize <= per_buffer_bytes:
        th = H
    else:
        th = max(128, (per_buffer_bytes // (tb * sub * itemsize)) // 128 * 128)

    # --- seq tile: as large as the per-buffer budget allows, sublane aligned.
    ts = per_buffer_bytes // max(1, tb * th * itemsize)
    ts = max(sub, (ts // sub) * sub)
    if ts >= S:
        ts = S

    nb = pl.cdiv(B, tb)
    nh = pl.cdiv(H, th)
    n_tiles = pl.cdiv(S, ts)

    # --- v7x: guarantee >= 2 parallel grid iterations so both TensorCores
    # stream HBM. If batch/hidden give only one, split the seq tiles into two
    # chunks producing independent partial sums (combined below).
    n_chunks = 2 if (nb * nh == 1 and n_tiles >= 2) else 1
    kt = pl.cdiv(n_tiles, n_chunks)            # seq tiles per chunk
    clamp = (kt * n_chunks != n_tiles)         # some (chunk, k) pairs overrun
    ragged = (S % ts != 0) or clamp
    last_tile = n_tiles - 1

    def in_map(c, b, h, k):
        s = c * kt + k
        if clamp:
            # Overrun tiles re-read the last valid tile; the kernel masks
            # their contribution to exactly zero.
            s = jnp.minimum(s, last_tile)
        return (b, s, h)

    def out_map(c, b, h, k):
        return (c, b, h)

    kernel = functools.partial(_avg_pool_sum_kernel, seq_len=S, tile_s=ts,
                               k_per_chunk=kt, ragged=ragged)

    partials = pl.pallas_call(
        kernel,
        out_shape=jax.ShapeDtypeStruct((n_chunks, B, H), jnp.float32),
        grid_spec=pltpu.PrefetchScalarGridSpec(
            num_scalar_prefetch=0,
            grid=(n_chunks, nb, nh, kt),
            in_specs=[pl.BlockSpec((tb, ts, th), in_map)],
            out_specs=pl.BlockSpec((None, tb, th), out_map),
        ),
        compiler_params=pltpu.CompilerParams(
            dimension_semantics=("parallel", "parallel", "parallel", "arbitrary"),
            vmem_limit_bytes=vmem_limit_bytes,
        ),
        cost_estimate=pl.CostEstimate(
            flops=B * S * H,
            transcendentals=0,
            bytes_accessed=B * S * H * itemsize + n_chunks * B * H * 4,
        ),
    )(hidden_states)

    total = jnp.sum(partials, axis=0) if n_chunks > 1 else partials[0]
    return (total * (1.0 / S)).astype(dtype)


if __name__ == "__main__":
    key = jax.random.PRNGKey(0)

    # Small shapes consistent with the module: batch=2, seq=8, hidden=32.
    B, S, H = 2, 8, 32
    x = jax.random.normal(key, (B, S, H), dtype=jnp.float32)
    out = jax.block_until_ready(avg_pooler(x))
    ref = jnp.mean(x, axis=1)
    assert out.shape == (B, H), out.shape
    assert jnp.allclose(out, ref, atol=1e-5, rtol=1e-5), "mismatch vs reference"

    # Exercise the ragged-seq / chunked / multi-tile paths with a tiny forced
    # per-buffer budget (still small data).
    B2, S2, H2 = 2, 37, 128
    x2 = jax.random.normal(jax.random.PRNGKey(1), (B2, S2, H2), dtype=jnp.float32)
    out2 = jax.block_until_ready(avg_pooler(x2, per_buffer_bytes=16 * 1024))
    ref2 = jnp.mean(x2, axis=1)
    assert out2.shape == (B2, H2), out2.shape
    assert jnp.allclose(out2, ref2, atol=1e-5, rtol=1e-5), "mismatch (ragged path)"

    print("KERNEL_OK")
</pallas_src>

<mosaic_0001>
module attributes {stable_mosaic.version = 11 : i64} {
  func.func @_avg_pool_sum_kernel(%arg0: i32, %arg1: i32, %arg2: i32, %arg3: i32, %arg4: memref<2x8x32xf32, #tpu.memory_space<vmem>>, %arg5: memref<1x2x32xf32, #tpu.memory_space<vmem>>) attributes {dimension_semantics = [#tpu.dimension_semantics<parallel>, #tpu.dimension_semantics<parallel>, #tpu.dimension_semantics<parallel>, #tpu.dimension_semantics<arbitrary>], iteration_bounds = array<i64: 1, 1, 1, 1>, scalar_prefetch = 0 : i64, scratch_operands = 0 : i64, tpu.core_type = #tpu.core_type<tc>, window_params = [{transform_indices = @transform_0, window_bounds = array<i64: 2, 8, 32>}, {transform_indices = @transform_1, window_bounds = array<i64: 1, 2, 32>}]} {
    %c0_i32 = arith.constant 0 : i32
    %0 = arith.cmpi eq, %arg3, %c0_i32 : i32
    %1 = arith.extui %0 : i1 to i32
    %c0_i32_0 = arith.constant 0 : i32
    %2 = arith.cmpi ne, %1, %c0_i32_0 : i32
    scf.if %2 {
      %cst_9 = arith.constant 0.000000e+00 : f32
      %11 = vector.broadcast %cst_9 : f32 to vector<2x32xf32>
      %c0_10 = arith.constant 0 : index
      %c0_11 = arith.constant 0 : index
      %c0_12 = arith.constant 0 : index
      %12 = vector.load %arg5[%c0_10, %c0_11, %c0_12] : memref<1x2x32xf32, #tpu.memory_space<vmem>>, vector<1x2x32xf32>
      %13 = vector.shape_cast %12 : vector<1x2x32xf32> to vector<2x32xf32>
      %14 = vector.shape_cast %11 : vector<2x32xf32> to vector<1x2x32xf32>
      tpu.vector_store %arg5[%c0_10, %c0_11, %c0_12], %14 {strides = array<i32>} : memref<1x2x32xf32, #tpu.memory_space<vmem>>, vector<1x2x32xf32>,
    } else {
    }
    %c0 = arith.constant 0 : index
    %c0_1 = arith.constant 0 : index
    %c0_2 = arith.constant 0 : index
    %3 = vector.load %arg5[%c0, %c0_1, %c0_2] : memref<1x2x32xf32, #tpu.memory_space<vmem>>, vector<1x2x32xf32>
    %4 = vector.shape_cast %3 : vector<1x2x32xf32> to vector<2x32xf32>
    %c0_3 = arith.constant 0 : index
    %c0_4 = arith.constant 0 : index
    %c0_5 = arith.constant 0 : index
    %5 = vector.load %arg4[%c0_3, %c0_4, %c0_5] : memref<2x8x32xf32, #tpu.memory_space<vmem>>, vector<2x8x32xf32>
    %cst = arith.constant dense<0.000000e+00> : vector<2x32xf32>
    %6 = vector.multi_reduction <add>, %5, %cst [1] : vector<2x8x32xf32> to vector<2x32xf32>
    %7 = arith.addf %4, %6 : vector<2x32xf32>
    %c0_6 = arith.constant 0 : index
    %c0_7 = arith.constant 0 : index
    %c0_8 = arith.constant 0 : index
    %8 = vector.load %arg5[%c0_6, %c0_7, %c0_8] : memref<1x2x32xf32, #tpu.memory_space<vmem>>, vector<1x2x32xf32>
    %9 = vector.shape_cast %8 : vector<1x2x32xf32> to vector<2x32xf32>
    %10 = vector.shape_cast %7 : vector<2x32xf32> to vector<1x2x32xf32>
    tpu.vector_store %arg5[%c0_6, %c0_7, %c0_8], %10 {strides = array<i32>} : memref<1x2x32xf32, #tpu.memory_space<vmem>>, vector<1x2x32xf32>,
    return
  }
  func.func @transform_0(%arg0: i32, %arg1: i32, %arg2: i32, %arg3: i32) -> (i32, i32, i32) {
    %c1_i32 = arith.constant 1 : i32
    %0 = arith.muli %arg0, %c1_i32 : i32
    %1 = arith.addi %0, %arg3 : i32
    %c0_i32 = arith.constant 0 : i32
    return %arg1, %1, %arg2 : i32, i32, i32
  }
  func.func @transform_1(%arg0: i32, %arg1: i32, %arg2: i32, %arg3: i32) -> (i32, i32, i32) {
    %c0_i32 = arith.constant 0 : i32
    return %arg0, %arg1, %arg2 : i32, i32, i32
  }
}

</mosaic_0001>

<bundles_post_ra>
// kernel: tpu_custom_call.1
= control target key start
LH: loop header
LB: loop body
LE: loop exit
PB: predicated region body
PF: predicated region fallthrough
CT: control target
= control target key end

     0   :  { %6 = vsyncpa [#allocation3], 0  ;;  %s168_s0 = inlined_call_operand.hbm [shape: f32[2,8,32], index: 0, kind: input, shape index: {}]   ;;  %s169_s1 = inlined_call_operand.hbm [shape: f32[1,2,32], index: 1, kind: output, shape index: {}]  }
   0x1   :  { %7 = vsyncpa [#allocation4], 0  ;;  %s127_s6 = smov [#allocation2]   ;;  %s79_s10 = scalar_lea.hbm %s168_s0, 256 }
   0x2   :  { %s16_s7 = sshll.u32 %s127_s6, 4  ;;  %p80_p0 = scmp.ne.s32.totalorder %s168_s0, %s79_s10  ;;  %s17_s7 = int_to_ptr.vmem [resolvable:$true] %s16_s7 }
   0x3   :  { %p83_p1 = scmp.lt.u32.totalorder %s79_s10, %s168_s0 }
   0x5   :  { %p85_p2 = pnand %p83_p1, %p80_p0 }
   0x7   :  { %88 = shalt.err (!%p85_p2)
}
   0x8   :  { %s89_s15 = scalar_lea.vmem %s17_s7, 256  ;;  %p94_p4 = scmp.lt.s32.totalorder %s17_s7, %s17_s7 }
   0x9   :  { %p90_p3 = scmp.ne.s32.totalorder %s17_s7, %s89_s15  ;;  %p95_p5 = scmp.lt.s32.totalorder %s89_s15, %s89_s15 }
   0xb   :  { %p96_p6 = por %p95_p5, %p94_p4 }
   0xd   :  { %p97_p7 = pnand %p96_p6, %p90_p3 }
   0xf   :  { %100 = shalt.err (!%p97_p7)
}
  0x10   :  { %s128_s16 = smov 128   ;;  %s129_s17 = smov 8  }
  0x11   :  { %22 = dma.hbm_to_vmem [thread:$0]  %s168_s0, 256, %s17_s7, [#allocation3], %s128_s16, %s128_s16, %s129_s17  }
  0x12   :  { %123 = dma.done.wait [#allocation3], 256  }
  0x13   :  { %124 = vsyncadd [#allocation3], 4294967040  ;;  %vm31_vm0 = vcmask 254976   ;;  %v130_v0 = vmov 0.0   ;;  %vm36_vm1 = vcmask 261120   ;;  %v34_v1 = vld [vmem:[#allocation2] sm:$0xff] }
  0x14   :  { %32 = vst.msk [vmem:[#allocation5] sm:$0x3] %vm31_vm0, %v130_v0  ;;  %v35_v2 = vld [vmem:[#allocation2 + $0x8] sm:$0xff]  ;;  %v37_v3 = vsel %vm36_vm1, %v34_v1, 0.0  ;;  %vm53_vm2 = vcmask 1041409   ;;  %s131_s0 = smov [#allocation5]  }
  0x15   :  { %v44_v4 = vsel %vm36_vm1, %v35_v2, 0.0  ;;  %v38_v5 = vrot.slane %v37_v3, 4  ;;  %s65_s20 = sshll.u32 %s131_s0, 4  ;;  %s66_s20 = int_to_ptr.vmem [resolvable:$true] %s65_s20 }
  0x16   :  { %v45_v6 = vrot.slane %v44_v4, 4  ;;  %s101_s21 = scalar_lea.vmem %s66_s20, 32  ;;  %p106_p9 = scmp.lt.s32.totalorder %s66_s20, %s66_s20 }
  0x17   :  { %v39_v7 = vadd.f32 %v38_v5, %v37_v3  ;;  %p102_p8 = scmp.ne.s32.totalorder %s66_s20, %s101_s21  ;;  %p107_p10 = scmp.lt.s32.totalorder %s101_s21, %s101_s21 }
  0x18   :  { %v46_v8 = vadd.f32 %v45_v6, %v44_v4 }
  0x19   :  { %v40_v9 = vrot.slane %v39_v7, 2  ;;  %p108_p11 = por %p107_p10, %p106_p9 }
  0x1a   :  { %v47_v10 = vrot.slane %v46_v8, 2 }
  0x1b   :  { %v41_v11 = vadd.f32 %v40_v9, %v39_v7  ;;  %v33_v15 = vld [vmem:[#allocation5] sm:$0x3]  ;;  %p109_p12 = pnand %p108_p11, %p102_p8 }
  0x1c   :  { %v48_v12 = vadd.f32 %v47_v10, %v46_v8 }
  0x1d   :  { %v42_v13 = vrot.slane %v41_v11, 1 }
  0x1e   :  { %v49_v14 = vrot.slane %v48_v12, 1 }
  0x1f   :  { %v43_v16 = vadd.f32 %v42_v13, %v41_v11 }
  0x20   :  { %v50_v17 = vadd.f32 %v49_v14, %v48_v12 }
  0x22   :  { %v54_v18 = vsel %vm53_vm2, %v50_v17, %v43_v16 }
  0x23   :  { %v56_v19 = vadd.f32 %v54_v18, %v33_v15 }
  0x25   :  { %58 = vst.msk [vmem:[#allocation5] sm:$0x3] %vm31_vm0, %v56_v19 }
  0x26   :  { %112 = shalt.err (!%p109_p12)
}
  0x27   :  { %s113_s24 = scalar_lea.hbm %s169_s1, 32 }
  0x28   :  { %p114_p13 = scmp.ne.s32.totalorder %s169_s1, %s113_s24  ;;  %p117_p0 = scmp.lt.u32.totalorder %s113_s24, %s169_s1 }
  0x2a   :  { %p119_p1 = pnand %p117_p0, %p114_p13 }
  0x2c   :  { %122 = shalt.err (!%p119_p1)
}
  0x2d   :  { %68 = dma.vmem_to_hbm [thread:$0]  %s66_s20, 32, %s169_s1, [#allocation4]  }
  0x2e   :  { %125 = dma.done.wait [#allocation4], 32  }
  0x2f   :  { %126 = vsyncadd [#allocation4], 4294967264 }
  0x30   :  { %72 = vsyncpa [#allocation3], 1 }
  0x31   :  { %73 = vsyncpa [#allocation4], 1 }

</bundles_post_ra>
